<compile_context>
chip_gen: v5e
topology: v5e:2x2
jax: 0.10.0
libtpu: 0.0.40
codegen_flags: <defaults>
</compile_context>

<pallas_src>
import functools

import jax
import jax.numpy as jnp
from jax.experimental import pallas as pl
from jax.experimental.pallas import tpu as pltpu


def _mqa_kernel(xq_ref, xkv_ref, wq_ref, bq_ref, wk_ref, bk_ref, wv_ref,
                bv_ref, wo_ref, bo_ref, o_ref,
                k_scratch, v_scratch, qrows_scratch, attn_scratch,
                *, num_heads_q, d_head, q_tile, compute_dtype):
    H, dh, tq = num_heads_q, d_head, q_tile
    iq = pl.program_id(1)

    # ---- shared K/V: compute once per batch element, cache in VMEM ---------
    @pl.when(iq == 0)
    def _():
        xkv = xkv_ref[0].astype(compute_dtype)                         # [n, d]
        k = jnp.dot(xkv, wk_ref[...],
                    preferred_element_type=jnp.float32) + bk_ref[...]  # [n, dh]
        v = jnp.dot(xkv, wv_ref[...],
                    preferred_element_type=jnp.float32) + bv_ref[...]  # [n, dh]
        # Fold the 1/sqrt(dh) score scale into K (cheaper than scaling Q or S).
        k_scratch[...] = (k * (1.0 / (dh ** 0.5))).astype(compute_dtype)
        v_scratch[...] = v.astype(compute_dtype)

    # ---- Q projection for this query tile -----------------------------------
    xq = xq_ref[0].astype(compute_dtype)                               # [tq, d]
    q = jnp.dot(xq, wq_ref[...],
                preferred_element_type=jnp.float32) + bq_ref[...]      # [tq, d] f32

    # Pack heads along rows: q_rows[h*tq + i, :] = q[i, h*dh:(h+1)*dh].
    # Static-slice copies; turns H small matmuls into one big one below.
    for h in range(H):
        qrows_scratch[h * tq:(h + 1) * tq, :] = q[:, h * dh:(h + 1) * dh]

    # ---- attention: ONE score matmul + ONE P@V matmul for all heads ---------
    qr = qrows_scratch[...].astype(compute_dtype)                      # [H*tq, dh]
    kt = k_scratch[...]                                                # [n, dh]
    s = jax.lax.dot_general(qr, kt, (((1,), (1,)), ((), ())),
                            preferred_element_type=jnp.float32)        # [H*tq, n]
    s = s - jnp.max(s, axis=-1, keepdims=True)
    p = jnp.exp(s)
    denom = jnp.sum(p, axis=-1, keepdims=True)                         # [H*tq, 1]
    pv = jnp.dot(p.astype(compute_dtype), v_scratch[...],
                 preferred_element_type=jnp.float32)                   # [H*tq, dh]
    # Deferred softmax normalization on the (much smaller) P@V output.
    pv = pv * pl.reciprocal(denom, approx=True)

    # Unpack heads to torch's concat layout: out[i, h*dh + d] = pv[h*tq + i, d].
    for h in range(H):
        attn_scratch[:, h * dh:(h + 1) * dh] = pv[h * tq:(h + 1) * tq, :]

    # ---- output projection ---------------------------------------------------
    out = jnp.dot(attn_scratch[...].astype(compute_dtype), wo_ref[...],
                  preferred_element_type=jnp.float32) + bo_ref[...]
    o_ref[0] = out.astype(o_ref.dtype)


def _pick_q_tile(n):
    for t in (128, 64, 32, 16, 8):
        if n % t == 0:
            return t
    return n


def multi_query_self_attention(x, params, *, num_heads_q=8, num_heads_kv=1,
                               q_tile=None, compute_dtype=jnp.bfloat16):
    """x: [b, n, d_model] -> [b, n, d_model].  MQA (num_heads_kv == 1)."""
    assert num_heads_kv == 1, "kernel implements the MQA (num_heads_kv == 1) case"
    b, n, d_model = x.shape
    assert d_model % num_heads_q == 0
    d_head = d_model // num_heads_q
    kv_dim = d_head * num_heads_kv

    tq = _pick_q_tile(n) if q_tile is None else q_tile
    assert n % tq == 0, "sequence length must be divisible by the query tile"
    n_q_tiles = n // tq

    # Weights [in, out] in the MXU compute dtype; biases stay f32 (f32 accum).
    wq = params["wq"].astype(compute_dtype)
    wk = params["wk"].astype(compute_dtype)
    wv = params["wv"].astype(compute_dtype)
    wo = params["wo"].astype(compute_dtype)
    bq2 = params["bq"].reshape(1, d_model).astype(jnp.float32)
    bk2 = params["bk"].reshape(1, kv_dim).astype(jnp.float32)
    bv2 = params["bv"].reshape(1, kv_dim).astype(jnp.float32)
    bo2 = params["bo"].reshape(1, d_model).astype(jnp.float32)

    kernel = functools.partial(
        _mqa_kernel, num_heads_q=num_heads_q, d_head=d_head, q_tile=tq,
        compute_dtype=compute_dtype)

    # ---- VMEM budget estimate (resident weights + tiles + score block) ------
    itx = x.dtype.itemsize
    itc = jnp.dtype(compute_dtype).itemsize
    est = (
        2 * (2 * d_model * d_model + 2 * d_model * kv_dim) * itc       # weights (dbl buf)
        + 2 * 2 * tq * d_model * itx                                   # x tile + out tile
        + 2 * n * d_model * itx                                        # full-x block
        + 2 * n * kv_dim * itc                                         # K/V scratch
        + num_heads_q * tq * d_head * 4 + tq * d_model * 4             # pack scratches
        + 2 * num_heads_q * tq * n * 4                                 # score temporaries
        + 4 * tq * d_model * 4                                         # misc f32 temps
    )
    vmem_limit = int(min(max(int(est * 1.5) + (4 << 20), 32 << 20), 64 << 20))

    const = lambda *shape: pl.BlockSpec(shape, lambda ib, iq: tuple(0 for _ in shape))

    return pl.pallas_call(
        kernel,
        out_shape=jax.ShapeDtypeStruct((b, n, d_model), x.dtype),
        grid_spec=pltpu.PrefetchScalarGridSpec(
            num_scalar_prefetch=0,
            grid=(b, n_q_tiles),
            in_specs=[
                pl.BlockSpec((1, tq, d_model), lambda ib, iq: (ib, iq, 0)),  # x (Q tile)
                pl.BlockSpec((1, n, d_model), lambda ib, iq: (ib, 0, 0)),    # x (full, for K/V)
                const(d_model, d_model),                                     # W_q
                const(1, d_model),                                           # b_q
                const(d_model, kv_dim),                                      # W_k
                const(1, kv_dim),                                            # b_k
                const(d_model, kv_dim),                                      # W_v
                const(1, kv_dim),                                            # b_v
                const(d_model, d_model),                                     # W_o
                const(1, d_model),                                           # b_o
            ],
            out_specs=pl.BlockSpec((1, tq, d_model), lambda ib, iq: (ib, iq, 0)),
            scratch_shapes=[
                pltpu.VMEM((n, kv_dim), compute_dtype),                  # K (pre-scaled)
                pltpu.VMEM((n, kv_dim), compute_dtype),                  # V
                pltpu.VMEM((num_heads_q * tq, d_head), jnp.float32),     # packed Q rows
                pltpu.VMEM((tq, d_model), jnp.float32),                  # head-concat out
            ],
        ),
        compiler_params=pltpu.CompilerParams(
            # K/V are carried in scratch across query tiles -> "arbitrary";
            # batch elements are independent -> "parallel" (megacore).
            dimension_semantics=("parallel", "arbitrary"),
            vmem_limit_bytes=vmem_limit,
        ),
    )(x, x, wq, bq2, wk, bk2, wv, bv2, wo, bo2)


def _reference(x, params, num_heads_q=8):
    """Pure-JAX reference mirroring the PyTorch forward."""
    b, n, d_model = x.shape
    d_head = d_model // num_heads_q
    q = x @ params["wq"] + params["bq"]
    k = x @ params["wk"] + params["bk"]
    v = x @ params["wv"] + params["bv"]
    q = q.reshape(b, n, num_heads_q, d_head).transpose(0, 2, 1, 3)   # [b,H,n,dh]
    k = k.reshape(b, n, 1, d_head).transpose(0, 2, 1, 3)             # [b,1,n,dh]
    v = v.reshape(b, n, 1, d_head).transpose(0, 2, 1, 3)
    s = jnp.einsum("bhnd,bkmd->bhnm", q, k) / (d_head ** 0.5)        # K broadcast over heads
    w = jax.nn.softmax(s, axis=-1)
    o = jnp.einsum("bhnm,bkmd->bhnd", w, v)
    o = o.transpose(0, 2, 1, 3).reshape(b, n, d_model)
    return o @ params["wo"] + params["bo"]


def _init_params(key, d_model, num_heads_q, num_heads_kv):
    d_head = d_model // num_heads_q
    kv_dim = d_head * num_heads_kv
    ks = jax.random.split(key, 8)
    scale = 1.0 / (d_model ** 0.5)
    return {
        "wq": jax.random.normal(ks[0], (d_model, d_model), jnp.float32) * scale,
        "bq": jax.random.normal(ks[1], (d_model,), jnp.float32) * 0.01,
        "wk": jax.random.normal(ks[2], (d_model, kv_dim), jnp.float32) * scale,
        "bk": jax.random.normal(ks[3], (kv_dim,), jnp.float32) * 0.01,
        "wv": jax.random.normal(ks[4], (d_model, kv_dim), jnp.float32) * scale,
        "bv": jax.random.normal(ks[5], (kv_dim,), jnp.float32) * 0.01,
        "wo": jax.random.normal(ks[6], (d_model, d_model), jnp.float32) * scale,
        "bo": jax.random.normal(ks[7], (d_model,), jnp.float32) * 0.01,
    }


if __name__ == "__main__":
    B, N, D_MODEL = 2, 8, 32
    NUM_HEADS_Q, NUM_HEADS_KV = 8, 1

    key = jax.random.PRNGKey(0)
    kx, kp = jax.random.split(key)
    x = jax.random.normal(kx, (B, N, D_MODEL), jnp.float32)
    params = _init_params(kp, D_MODEL, NUM_HEADS_Q, NUM_HEADS_KV)

    ref = _reference(x, params, num_heads_q=NUM_HEADS_Q)

    # bf16 MXU path (default on v6e/v7x): bf16 operands, f32 accumulation.
    out_bf16 = multi_query_self_attention(
        x, params, num_heads_q=NUM_HEADS_Q, num_heads_kv=NUM_HEADS_KV,
        compute_dtype=jnp.bfloat16)
    out_bf16 = jax.block_until_ready(out_bf16)
    assert out_bf16.shape == (B, N, D_MODEL)
    assert jnp.allclose(out_bf16, ref, atol=3e-2, rtol=3e-2), "bf16 path mismatch"

    # f32 path (tighter structural check of the kernel itself).
    out_f32 = multi_query_self_attention(
        x, params, num_heads_q=NUM_HEADS_Q, num_heads_kv=NUM_HEADS_KV,
        compute_dtype=jnp.float32)
    out_f32 = jax.block_until_ready(out_f32)
    assert jnp.allclose(out_f32, ref, atol=1e-2, rtol=1e-2), "f32 path mismatch"

    print("KERNEL_OK")
</pallas_src>

<mosaic_0001>
module attributes {stable_mosaic.version = 11 : i64} {
  func.func @_mqa_kernel(%arg0: i32, %arg1: i32, %arg2: memref<1x8x32xf32, #tpu.memory_space<vmem>>, %arg3: memref<1x8x32xf32, #tpu.memory_space<vmem>>, %arg4: memref<32x32xbf16, #tpu.memory_space<vmem>>, %arg5: memref<1x32xf32, #tpu.memory_space<vmem>>, %arg6: memref<32x4xbf16, #tpu.memory_space<vmem>>, %arg7: memref<1x4xf32, #tpu.memory_space<vmem>>, %arg8: memref<32x4xbf16, #tpu.memory_space<vmem>>, %arg9: memref<1x4xf32, #tpu.memory_space<vmem>>, %arg10: memref<32x32xbf16, #tpu.memory_space<vmem>>, %arg11: memref<1x32xf32, #tpu.memory_space<vmem>>, %arg12: memref<1x8x32xf32, #tpu.memory_space<vmem>>, %arg13: memref<8x4xbf16, #tpu.memory_space<vmem>>, %arg14: memref<8x4xbf16, #tpu.memory_space<vmem>>, %arg15: memref<64x4xf32, #tpu.memory_space<vmem>>, %arg16: memref<8x32xf32, #tpu.memory_space<vmem>>) attributes {dimension_semantics = [#tpu.dimension_semantics<parallel>, #tpu.dimension_semantics<arbitrary>], iteration_bounds = array<i64: 2, 1>, scalar_prefetch = 0 : i64, scratch_operands = 4 : i64, tpu.core_type = #tpu.core_type<tc>, window_params = [{transform_indices = @transform_0, window_bounds = array<i64: 1, 8, 32>}, {transform_indices = @transform_1, window_bounds = array<i64: 1, 8, 32>}, {pipeline_mode = #tpu.pipeline_mode<synchronous>, transform_indices = @transform_2, window_bounds = array<i64: 32, 32>}, {pipeline_mode = #tpu.pipeline_mode<synchronous>, transform_indices = @transform_3, window_bounds = array<i64: 1, 32>}, {pipeline_mode = #tpu.pipeline_mode<synchronous>, transform_indices = @transform_4, window_bounds = array<i64: 32, 4>}, {pipeline_mode = #tpu.pipeline_mode<synchronous>, transform_indices = @transform_5, window_bounds = array<i64: 1, 4>}, {pipeline_mode = #tpu.pipeline_mode<synchronous>, transform_indices = @transform_6, window_bounds = array<i64: 32, 4>}, {pipeline_mode = #tpu.pipeline_mode<synchronous>, transform_indices = @transform_7, window_bounds = array<i64: 1, 4>}, {pipeline_mode = #tpu.pipeline_mode<synchronous>, transform_indices = @transform_8, window_bounds = array<i64: 32, 32>}, {pipeline_mode = #tpu.pipeline_mode<synchronous>, transform_indices = @transform_9, window_bounds = array<i64: 1, 32>}, {transform_indices = @transform_10, window_bounds = array<i64: 1, 8, 32>}]} {
    %c0_i32 = arith.constant 0 : i32
    %0 = arith.cmpi eq, %arg1, %c0_i32 : i32
    %1 = arith.extui %0 : i1 to i32
    %c0_i32_0 = arith.constant 0 : i32
    %2 = arith.cmpi ne, %1, %c0_i32_0 : i32
    scf.if %2 {
      %c0_48 = arith.constant 0 : index
      %c0_49 = arith.constant 0 : index
      %c0_50 = arith.constant 0 : index
      %70 = vector.load %arg3[%c0_48, %c0_49, %c0_50] : memref<1x8x32xf32, #tpu.memory_space<vmem>>, vector<1x8x32xf32>
      %71 = vector.shape_cast %70 : vector<1x8x32xf32> to vector<8x32xf32>
      %72 = arith.truncf %71 : vector<8x32xf32> to vector<8x32xbf16>
      %c0_51 = arith.constant 0 : index
      %c0_52 = arith.constant 0 : index
      %73 = vector.load %arg6[%c0_51, %c0_52] : memref<32x4xbf16, #tpu.memory_space<vmem>>, vector<32x4xbf16>
      %cst_53 = arith.constant dense<0.000000e+00> : vector<8x4xf32>
      %74 = tpu.matmul %72, %73, %cst_53 {dimension_numbers = #tpu.dot_dimension_numbers<[1], [0], [0], [1], [0, 0, 1, 1], [], []>} : vector<8x32xbf16>, vector<32x4xbf16>, vector<8x4xf32> -> vector<8x4xf32>
      %c0_54 = arith.constant 0 : index
      %c0_55 = arith.constant 0 : index
      %75 = vector.load %arg7[%c0_54, %c0_55] : memref<1x4xf32, #tpu.memory_space<vmem>>, vector<1x4xf32>
      %76 = vector.broadcast %75 : vector<1x4xf32> to vector<8x4xf32>
      %77 = arith.addf %74, %76 : vector<8x4xf32>
      %c0_56 = arith.constant 0 : index
      %c0_57 = arith.constant 0 : index
      %78 = vector.load %arg8[%c0_56, %c0_57] : memref<32x4xbf16, #tpu.memory_space<vmem>>, vector<32x4xbf16>
      %cst_58 = arith.constant dense<0.000000e+00> : vector<8x4xf32>
      %79 = tpu.matmul %72, %78, %cst_58 {dimension_numbers = #tpu.dot_dimension_numbers<[1], [0], [0], [1], [0, 0, 1, 1], [], []>} : vector<8x32xbf16>, vector<32x4xbf16>, vector<8x4xf32> -> vector<8x4xf32>
      %c0_59 = arith.constant 0 : index
      %c0_60 = arith.constant 0 : index
      %80 = vector.load %arg9[%c0_59, %c0_60] : memref<1x4xf32, #tpu.memory_space<vmem>>, vector<1x4xf32>
      %81 = vector.broadcast %80 : vector<1x4xf32> to vector<8x4xf32>
      %82 = arith.addf %79, %81 : vector<8x4xf32>
      %cst_61 = arith.constant 5.000000e-01 : f32
      %83 = vector.broadcast %cst_61 : f32 to vector<8x4xf32>
      %84 = arith.mulf %77, %83 : vector<8x4xf32>
      %85 = arith.truncf %84 : vector<8x4xf32> to vector<8x4xbf16>
      %c0_62 = arith.constant 0 : index
      %c0_63 = arith.constant 0 : index
      %86 = vector.load %arg13[%c0_62, %c0_63] : memref<8x4xbf16, #tpu.memory_space<vmem>>, vector<8x4xbf16>
      tpu.vector_store %arg13[%c0_62, %c0_63], %85 {strides = array<i32>} : memref<8x4xbf16, #tpu.memory_space<vmem>>, vector<8x4xbf16>,
      %87 = arith.truncf %82 : vector<8x4xf32> to vector<8x4xbf16>
      %c0_64 = arith.constant 0 : index
      %c0_65 = arith.constant 0 : index
      %88 = vector.load %arg14[%c0_64, %c0_65] : memref<8x4xbf16, #tpu.memory_space<vmem>>, vector<8x4xbf16>
      tpu.vector_store %arg14[%c0_64, %c0_65], %87 {strides = array<i32>} : memref<8x4xbf16, #tpu.memory_space<vmem>>, vector<8x4xbf16>,
    } else {
    }
    %c0 = arith.constant 0 : index
    %c0_1 = arith.constant 0 : index
    %c0_2 = arith.constant 0 : index
    %3 = vector.load %arg2[%c0, %c0_1, %c0_2] : memref<1x8x32xf32, #tpu.memory_space<vmem>>, vector<1x8x32xf32>
    %4 = vector.shape_cast %3 : vector<1x8x32xf32> to vector<8x32xf32>
    %5 = arith.truncf %4 : vector<8x32xf32> to vector<8x32xbf16>
    %c0_3 = arith.constant 0 : index
    %c0_4 = arith.constant 0 : index
    %6 = vector.load %arg4[%c0_3, %c0_4] : memref<32x32xbf16, #tpu.memory_space<vmem>>, vector<32x32xbf16>
    %cst = arith.constant dense<0.000000e+00> : vector<8x32xf32>
    %7 = tpu.matmul %5, %6, %cst {dimension_numbers = #tpu.dot_dimension_numbers<[1], [0], [0], [1], [0, 0, 1, 1], [], []>} : vector<8x32xbf16>, vector<32x32xbf16>, vector<8x32xf32> -> vector<8x32xf32>
    %c0_5 = arith.constant 0 : index
    %c0_6 = arith.constant 0 : index
    %8 = vector.load %arg5[%c0_5, %c0_6] : memref<1x32xf32, #tpu.memory_space<vmem>>, vector<1x32xf32>
    %9 = vector.broadcast %8 : vector<1x32xf32> to vector<8x32xf32>
    %10 = arith.addf %7, %9 : vector<8x32xf32>
    %11 = vector.extract_strided_slice %10 {offsets = [0, 0], sizes = [8, 4], strides = [1, 1]} : vector<8x32xf32> to vector<8x4xf32>
    %c0_7 = arith.constant 0 : index
    %c0_8 = arith.constant 0 : index
    %12 = vector.load %arg15[%c0_7, %c0_8] : memref<64x4xf32, #tpu.memory_space<vmem>>, vector<8x4xf32>
    tpu.vector_store %arg15[%c0_7, %c0_8], %11 {strides = array<i32>} : memref<64x4xf32, #tpu.memory_space<vmem>>, vector<8x4xf32>,
    %13 = vector.extract_strided_slice %10 {offsets = [0, 4], sizes = [8, 4], strides = [1, 1]} : vector<8x32xf32> to vector<8x4xf32>
    %c8 = arith.constant 8 : index
    %c0_9 = arith.constant 0 : index
    %14 = vector.load %arg15[%c8, %c0_9] : memref<64x4xf32, #tpu.memory_space<vmem>>, vector<8x4xf32>
    tpu.vector_store %arg15[%c8, %c0_9], %13 {strides = array<i32>} : memref<64x4xf32, #tpu.memory_space<vmem>>, vector<8x4xf32>,
    %15 = vector.extract_strided_slice %10 {offsets = [0, 8], sizes = [8, 4], strides = [1, 1]} : vector<8x32xf32> to vector<8x4xf32>
    %c16 = arith.constant 16 : index
    %c0_10 = arith.constant 0 : index
    %16 = vector.load %arg15[%c16, %c0_10] : memref<64x4xf32, #tpu.memory_space<vmem>>, vector<8x4xf32>
    tpu.vector_store %arg15[%c16, %c0_10], %15 {strides = array<i32>} : memref<64x4xf32, #tpu.memory_space<vmem>>, vector<8x4xf32>,
    %17 = vector.extract_strided_slice %10 {offsets = [0, 12], sizes = [8, 4], strides = [1, 1]} : vector<8x32xf32> to vector<8x4xf32>
    %c24 = arith.constant 24 : index
    %c0_11 = arith.constant 0 : index
    %18 = vector.load %arg15[%c24, %c0_11] : memref<64x4xf32, #tpu.memory_space<vmem>>, vector<8x4xf32>
    tpu.vector_store %arg15[%c24, %c0_11], %17 {strides = array<i32>} : memref<64x4xf32, #tpu.memory_space<vmem>>, vector<8x4xf32>,
    %19 = vector.extract_strided_slice %10 {offsets = [0, 16], sizes = [8, 4], strides = [1, 1]} : vector<8x32xf32> to vector<8x4xf32>
    %c32 = arith.constant 32 : index
    %c0_12 = arith.constant 0 : index
    %20 = vector.load %arg15[%c32, %c0_12] : memref<64x4xf32, #tpu.memory_space<vmem>>, vector<8x4xf32>
    tpu.vector_store %arg15[%c32, %c0_12], %19 {strides = array<i32>} : memref<64x4xf32, #tpu.memory_space<vmem>>, vector<8x4xf32>,
    %21 = vector.extract_strided_slice %10 {offsets = [0, 20], sizes = [8, 4], strides = [1, 1]} : vector<8x32xf32> to vector<8x4xf32>
    %c40 = arith.constant 40 : index
    %c0_13 = arith.constant 0 : index
    %22 = vector.load %arg15[%c40, %c0_13] : memref<64x4xf32, #tpu.memory_space<vmem>>, vector<8x4xf32>
    tpu.vector_store %arg15[%c40, %c0_13], %21 {strides = array<i32>} : memref<64x4xf32, #tpu.memory_space<vmem>>, vector<8x4xf32>,
    %23 = vector.extract_strided_slice %10 {offsets = [0, 24], sizes = [8, 4], strides = [1, 1]} : vector<8x32xf32> to vector<8x4xf32>
    %c48 = arith.constant 48 : index
    %c0_14 = arith.constant 0 : index
    %24 = vector.load %arg15[%c48, %c0_14] : memref<64x4xf32, #tpu.memory_space<vmem>>, vector<8x4xf32>
    tpu.vector_store %arg15[%c48, %c0_14], %23 {strides = array<i32>} : memref<64x4xf32, #tpu.memory_space<vmem>>, vector<8x4xf32>,
    %25 = vector.extract_strided_slice %10 {offsets = [0, 28], sizes = [8, 4], strides = [1, 1]} : vector<8x32xf32> to vector<8x4xf32>
    %c56 = arith.constant 56 : index
    %c0_15 = arith.constant 0 : index
    %26 = vector.load %arg15[%c56, %c0_15] : memref<64x4xf32, #tpu.memory_space<vmem>>, vector<8x4xf32>
    tpu.vector_store %arg15[%c56, %c0_15], %25 {strides = array<i32>} : memref<64x4xf32, #tpu.memory_space<vmem>>, vector<8x4xf32>,
    %c0_16 = arith.constant 0 : index
    %c0_17 = arith.constant 0 : index
    %27 = vector.load %arg15[%c0_16, %c0_17] : memref<64x4xf32, #tpu.memory_space<vmem>>, vector<64x4xf32>
    %28 = arith.truncf %27 : vector<64x4xf32> to vector<64x4xbf16>
    %c0_18 = arith.constant 0 : index
    %c0_19 = arith.constant 0 : index
    %29 = vector.load %arg13[%c0_18, %c0_19] : memref<8x4xbf16, #tpu.memory_space<vmem>>, vector<8x4xbf16>
    %cst_20 = arith.constant dense<0.000000e+00> : vector<64x8xf32>
    %30 = tpu.matmul %28, %29, %cst_20 {dimension_numbers = #tpu.dot_dimension_numbers<[1], [1], [0], [0], [0, 0, 1, 0], [], []>} : vector<64x4xbf16>, vector<8x4xbf16>, vector<64x8xf32> -> vector<64x8xf32>
    %cst_21 = arith.constant dense<0xFF800000> : vector<64xf32>
    %31 = vector.multi_reduction <maximumf>, %30, %cst_21 [1] : vector<64x8xf32> to vector<64xf32>
    %32 = vector.shape_cast %31 : vector<64xf32> to vector<64x1xf32>
    %33 = vector.broadcast %32 : vector<64x1xf32> to vector<64x8xf32>
    %34 = arith.subf %30, %33 : vector<64x8xf32>
    %35 = math.exp %34 : vector<64x8xf32>
    %cst_22 = arith.constant dense<0.000000e+00> : vector<64xf32>
    %36 = vector.multi_reduction <add>, %35, %cst_22 [1] : vector<64x8xf32> to vector<64xf32>
    %37 = vector.shape_cast %36 : vector<64xf32> to vector<64x1xf32>
    %38 = arith.truncf %35 : vector<64x8xf32> to vector<64x8xbf16>
    %c0_23 = arith.constant 0 : index
    %c0_24 = arith.constant 0 : index
    %39 = vector.load %arg14[%c0_23, %c0_24] : memref<8x4xbf16, #tpu.memory_space<vmem>>, vector<8x4xbf16>
    %cst_25 = arith.constant dense<0.000000e+00> : vector<64x4xf32>
    %40 = tpu.matmul %38, %39, %cst_25 {dimension_numbers = #tpu.dot_dimension_numbers<[1], [0], [0], [1], [0, 0, 1, 1], [], []>} : vector<64x8xbf16>, vector<8x4xbf16>, vector<64x4xf32> -> vector<64x4xf32>
    %41 = tpu.reciprocal %37 {approx = true} : vector<64x1xf32> -> vector<64x1xf32>
    %42 = vector.broadcast %41 : vector<64x1xf32> to vector<64x4xf32>
    %43 = arith.mulf %40, %42 : vector<64x4xf32>
    %44 = vector.extract_strided_slice %43 {offsets = [0, 0], sizes = [8, 4], strides = [1, 1]} : vector<64x4xf32> to vector<8x4xf32>
    %c0_26 = arith.constant 0 : index
    %c0_27 = arith.constant 0 : index
    %45 = vector.load %arg16[%c0_26, %c0_27] : memref<8x32xf32, #tpu.memory_space<vmem>>, vector<8x4xf32>
    tpu.vector_store %arg16[%c0_26, %c0_27], %44 {strides = array<i32>} : memref<8x32xf32, #tpu.memory_space<vmem>>, vector<8x4xf32>,
    %46 = vector.extract_strided_slice %43 {offsets = [8, 0], sizes = [8, 4], strides = [1, 1]} : vector<64x4xf32> to vector<8x4xf32>
    %c0_28 = arith.constant 0 : index
    %c4 = arith.constant 4 : index
    %47 = vector.load %arg16[%c0_28, %c4] : memref<8x32xf32, #tpu.memory_space<vmem>>, vector<8x4xf32>
    tpu.vector_store %arg16[%c0_28, %c4], %46 {strides = array<i32>} : memref<8x32xf32, #tpu.memory_space<vmem>>, vector<8x4xf32>,
    %48 = vector.extract_strided_slice %43 {offsets = [16, 0], sizes = [8, 4], strides = [1, 1]} : vector<64x4xf32> to vector<8x4xf32>
    %c0_29 = arith.constant 0 : index
    %c8_30 = arith.constant 8 : index
    %49 = vector.load %arg16[%c0_29, %c8_30] : memref<8x32xf32, #tpu.memory_space<vmem>>, vector<8x4xf32>
    tpu.vector_store %arg16[%c0_29, %c8_30], %48 {strides = array<i32>} : memref<8x32xf32, #tpu.memory_space<vmem>>, vector<8x4xf32>,
    %50 = vector.extract_strided_slice %43 {offsets = [24, 0], sizes = [8, 4], strides = [1, 1]} : vector<64x4xf32> to vector<8x4xf32>
    %c0_31 = arith.constant 0 : index
    %c12 = arith.constant 12 : index
    %51 = vector.load %arg16[%c0_31, %c12] : memref<8x32xf32, #tpu.memory_space<vmem>>, vector<8x4xf32>
    tpu.vector_store %arg16[%c0_31, %c12], %50 {strides = array<i32>} : memref<8x32xf32, #tpu.memory_space<vmem>>, vector<8x4xf32>,
    %52 = vector.extract_strided_slice %43 {offsets = [32, 0], sizes = [8, 4], strides = [1, 1]} : vector<64x4xf32> to vector<8x4xf32>
    %c0_32 = arith.constant 0 : index
    %c16_33 = arith.constant 16 : index
    %53 = vector.load %arg16[%c0_32, %c16_33] : memref<8x32xf32, #tpu.memory_space<vmem>>, vector<8x4xf32>
    tpu.vector_store %arg16[%c0_32, %c16_33], %52 {strides = array<i32>} : memref<8x32xf32, #tpu.memory_space<vmem>>, vector<8x4xf32>,
    %54 = vector.extract_strided_slice %43 {offsets = [40, 0], sizes = [8, 4], strides = [1, 1]} : vector<64x4xf32> to vector<8x4xf32>
    %c0_34 = arith.constant 0 : index
    %c20 = arith.constant 20 : index
    %55 = vector.load %arg16[%c0_34, %c20] : memref<8x32xf32, #tpu.memory_space<vmem>>, vector<8x4xf32>
    tpu.vector_store %arg16[%c0_34, %c20], %54 {strides = array<i32>} : memref<8x32xf32, #tpu.memory_space<vmem>>, vector<8x4xf32>,
    %56 = vector.extract_strided_slice %43 {offsets = [48, 0], sizes = [8, 4], strides = [1, 1]} : vector<64x4xf32> to vector<8x4xf32>
    %c0_35 = arith.constant 0 : index
    %c24_36 = arith.constant 24 : index
    %57 = vector.load %arg16[%c0_35, %c24_36] : memref<8x32xf32, #tpu.memory_space<vmem>>, vector<8x4xf32>
    tpu.vector_store %arg16[%c0_35, %c24_36], %56 {strides = array<i32>} : memref<8x32xf32, #tpu.memory_space<vmem>>, vector<8x4xf32>,
    %58 = vector.extract_strided_slice %43 {offsets = [56, 0], sizes = [8, 4], strides = [1, 1]} : vector<64x4xf32> to vector<8x4xf32>
    %c0_37 = arith.constant 0 : index
    %c28 = arith.constant 28 : index
    %59 = vector.load %arg16[%c0_37, %c28] : memref<8x32xf32, #tpu.memory_space<vmem>>, vector<8x4xf32>
    tpu.vector_store %arg16[%c0_37, %c28], %58 {strides = array<i32>} : memref<8x32xf32, #tpu.memory_space<vmem>>, vector<8x4xf32>,
    %c0_38 = arith.constant 0 : index
    %c0_39 = arith.constant 0 : index
    %60 = vector.load %arg16[%c0_38, %c0_39] : memref<8x32xf32, #tpu.memory_space<vmem>>, vector<8x32xf32>
    %61 = arith.truncf %60 : vector<8x32xf32> to vector<8x32xbf16>
    %c0_40 = arith.constant 0 : index
    %c0_41 = arith.constant 0 : index
    %62 = vector.load %arg10[%c0_40, %c0_41] : memref<32x32xbf16, #tpu.memory_space<vmem>>, vector<32x32xbf16>
    %cst_42 = arith.constant dense<0.000000e+00> : vector<8x32xf32>
    %63 = tpu.matmul %61, %62, %cst_42 {dimension_numbers = #tpu.dot_dimension_numbers<[1], [0], [0], [1], [0, 0, 1, 1], [], []>} : vector<8x32xbf16>, vector<32x32xbf16>, vector<8x32xf32> -> vector<8x32xf32>
    %c0_43 = arith.constant 0 : index
    %c0_44 = arith.constant 0 : index
    %64 = vector.load %arg11[%c0_43, %c0_44] : memref<1x32xf32, #tpu.memory_space<vmem>>, vector<1x32xf32>
    %65 = vector.broadcast %64 : vector<1x32xf32> to vector<8x32xf32>
    %66 = arith.addf %63, %65 : vector<8x32xf32>
    %c0_45 = arith.constant 0 : index
    %c0_46 = arith.constant 0 : index
    %c0_47 = arith.constant 0 : index
    %67 = vector.load %arg12[%c0_45, %c0_46, %c0_47] : memref<1x8x32xf32, #tpu.memory_space<vmem>>, vector<1x8x32xf32>
    %68 = vector.shape_cast %67 : vector<1x8x32xf32> to vector<8x32xf32>
    %69 = vector.shape_cast %66 : vector<8x32xf32> to vector<1x8x32xf32>
    tpu.vector_store %arg12[%c0_45, %c0_46, %c0_47], %69 {strides = array<i32>} : memref<1x8x32xf32, #tpu.memory_space<vmem>>, vector<1x8x32xf32>,
    return
  }
  func.func @transform_0(%arg0: i32, %arg1: i32) -> (i32, i32, i32) {
    %c0_i32 = arith.constant 0 : i32
    %c0_i32_0 = arith.constant 0 : i32
    return %arg0, %arg1, %c0_i32 : i32, i32, i32
  }
  func.func @transform_1(%arg0: i32, %arg1: i32) -> (i32, i32, i32) {
    %c0_i32 = arith.constant 0 : i32
    %c0_i32_0 = arith.constant 0 : i32
    %c0_i32_1 = arith.constant 0 : i32
    return %arg0, %c0_i32, %c0_i32_0 : i32, i32, i32
  }
  func.func @transform_2(%arg0: i32, %arg1: i32) -> (i32, i32) {
    %c0_i32 = arith.constant 0 : i32
    %c0_i32_0 = arith.constant 0 : i32
    %c0_i32_1 = arith.constant 0 : i32
    return %c0_i32, %c0_i32_0 : i32, i32
  }
  func.func @transform_3(%arg0: i32, %arg1: i32) -> (i32, i32) {
    %c0_i32 = arith.constant 0 : i32
    %c0_i32_0 = arith.constant 0 : i32
    %c0_i32_1 = arith.constant 0 : i32
    return %c0_i32, %c0_i32_0 : i32, i32
  }
  func.func @transform_4(%arg0: i32, %arg1: i32) -> (i32, i32) {
    %c0_i32 = arith.constant 0 : i32
    %c0_i32_0 = arith.constant 0 : i32
    %c0_i32_1 = arith.constant 0 : i32
    return %c0_i32, %c0_i32_0 : i32, i32
  }
  func.func @transform_5(%arg0: i32, %arg1: i32) -> (i32, i32) {
    %c0_i32 = arith.constant 0 : i32
    %c0_i32_0 = arith.constant 0 : i32
    %c0_i32_1 = arith.constant 0 : i32
    return %c0_i32, %c0_i32_0 : i32, i32
  }
  func.func @transform_6(%arg0: i32, %arg1: i32) -> (i32, i32) {
    %c0_i32 = arith.constant 0 : i32
    %c0_i32_0 = arith.constant 0 : i32
    %c0_i32_1 = arith.constant 0 : i32
    return %c0_i32, %c0_i32_0 : i32, i32
  }
  func.func @transform_7(%arg0: i32, %arg1: i32) -> (i32, i32) {
    %c0_i32 = arith.constant 0 : i32
    %c0_i32_0 = arith.constant 0 : i32
    %c0_i32_1 = arith.constant 0 : i32
    return %c0_i32, %c0_i32_0 : i32, i32
  }
  func.func @transform_8(%arg0: i32, %arg1: i32) -> (i32, i32) {
    %c0_i32 = arith.constant 0 : i32
    %c0_i32_0 = arith.constant 0 : i32
    %c0_i32_1 = arith.constant 0 : i32
    return %c0_i32, %c0_i32_0 : i32, i32
  }
  func.func @transform_9(%arg0: i32, %arg1: i32) -> (i32, i32) {
    %c0_i32 = arith.constant 0 : i32
    %c0_i32_0 = arith.constant 0 : i32
    %c0_i32_1 = arith.constant 0 : i32
    return %c0_i32, %c0_i32_0 : i32, i32
  }
  func.func @transform_10(%arg0: i32, %arg1: i32) -> (i32, i32, i32) {
    %c0_i32 = arith.constant 0 : i32
    %c0_i32_0 = arith.constant 0 : i32
    return %arg0, %arg1, %c0_i32 : i32, i32, i32
  }
}

</mosaic_0001>

<bundles_post_ra>
// kernel: tpu_custom_call.1
= control target key start
LH: loop header
LB: loop body
LE: loop exit
PB: predicated region body
PF: predicated region fallthrough
CT: control target
= control target key end

     0   :  { %15 = vsyncpa [#allocation7], 0  ;;  %s1596_s0 = inlined_call_operand.vmem [shape: f32[2,8,32], index: 0, kind: input, shape index: {}]   ;;  %s1597_s1 = inlined_call_operand.vmem [shape: f32[2,8,32], index: 1, kind: input, shape index: {}]   ;;  %s1598_s2 = inlined_call_operand.hbm [shape: bf16[32,32], index: 2, kind: input, shape index: {}]   ;;  %s1599_s3 = inlined_call_operand.vmem [shape: f32[1,32], index: 3, kind: input, shape index: {}]   ;;  %s1600_s4 = inlined_call_operand.vmem [shape: bf16[32,4], index: 4, kind: input, shape index: {}]   ;;  %s1601_s5 = inlined_call_operand.vmem [shape: f32[1,4], index: 5, kind: input, shape index: {}]   ;;  %s1602_s6 = inlined_call_operand.vmem [shape: bf16[32,4], index: 6, kind: input, shape index: {}]   ;;  %s1603_s7 = inlined_call_operand.vmem [shape: f32[1,4], index: 7, kind: input, shape index: {}]   ;;  %s1604_s8 = inlined_call_operand.hbm [shape: bf16[32,32], index: 8, kind: input, shape index: {}]   ;;  %s1605_s9 = inlined_call_operand.vmem [shape: f32[1,32], index: 9, kind: input, shape index: {}]   ;;  %s1606_s10 = inlined_call_operand.hbm [shape: f32[2,8,32], index: 10, kind: output, shape index: {}]  }
   0x1   :  { %16 = vsyncpa [#allocation10], 0 }
   0x2   :  { %17 = vsyncpa [#allocation8], 0 }
   0x3   :  { %19 = vsyncpa [#allocation8 + $0x1], 0  ;;  %s1403_s13 = smov 0   ;;  %s1405_s14 = smov 0  }
   0x4   :  { %s1407_s15 = smov 0   ;;  %s1409_s16 = smov 0  }
   0x5   :  { %s1411_s17 = smov 0   ;;  %s1413_s18 = smov 0  }
   0x6 LB: > { %1609 = sst [smem:[#allocation15_spill]] %s1324_s17  ;;  %s984_s19 = sadd.s32 4294967295, %s1328_s18   ;;  %s1328_s18 = sphi %s1413_s18, %s25_s18   ;;  %s1324_s17 = sphi %s1411_s17, %s1618_s17   ;;  %s1320_s16 = sphi %s1409_s16, %s1617_s16   ;;  %s1316_s15 = sphi %s1407_s15, %s1621_s15   ;;  %s1312_s14 = sphi %s1405_s14, %s1620_s14   ;;  %s1308_s13 = sphi %s1403_s13, %s1619_s13  }
   0x7   : > { %s985_s20 = sadd.s32 4294967294, %s1328_s18   ;;  %s37_s21 = sadd.s32 1, %s1324_s17 }
   0x8   : > { %s268_s22 = sadd.s32 1, %s1316_s15  ;;  %p39_p0 = scmp.ge.s32.totalorder %s37_s21, 2 }
   0x9   : > { %p278_p1 = scmp.ne.s32.totalorder %s1316_s15, %s1312_s14  ;;  %p279_p2 = scmp.eq.s32.totalorder %s984_s19, 1 }
   0xa   : > { %p284_p3 = scmp.ne.s32.totalorder %s1312_s14, %s1308_s13  ;;  %s1623_s21 = smov (%p39_p0, %s37_s21), 0 }
   0xb   : > { %1610 = sst [smem:[#allocation16_spill]] %s1623_s21  ;;  %p1443_p4 = por %p279_p2, %p278_p1 }
   0xc   : > { %p285_p5 = scmp.eq.s32.totalorder %s985_s20, 1  ;;  %s263_s24 = ssub.s32 %s1324_s17, %s1623_s21 }
   0xd   : > { %p986_p6 = scmp.ge.s32.totalorder %s1328_s18, 1  ;;  %p266_p7 = scmp.eq.s32.totalorder %s263_s24, 0 }
   0xe   : > { %p1450_p8 = por %p285_p5, %p284_p3  ;;  %p292_p9 = scmp.lt.s32.totalorder %s1328_s18, 3 }
   0xf   : > { %s1456_s26 = scalar_select %p266_p7, %s1316_s15, %s268_s22  }
  0x10   : > { %p1458_p10 = pnand %p986_p6, %p292_p9  ;;  %p1462_p11 = scmp.eq.s32.totalorder %s984_s19, 0 }
  0x11   : > { %1613 = sst [smem:[#allocation17_spill]] %s1456_s26  ;;  %s303_s11 = sshll.u32 %s1598_s2, 4  ;;  %s304_s11 = int_to_ptr.hbm [resolvable:$true] %s303_s11 }
  0x12   : > { %p1064_p12 = pneg %p1458_p10  ;;  %s1330_s12 = smov [#allocation6]  }
  0x13   : > { %s305_s20 = sshll.u32 %s1330_s12, 4  ;;  %s332_s19 = sshll.u32 %s1604_s8, 4  ;;  %s306_s20 = int_to_ptr.vmem [resolvable:$true] %s305_s20  ;;  %s333_s19 = int_to_ptr.hbm [resolvable:$true] %s332_s19 }
  0x14   : > { %p1065_p13 = pnand %p1462_p11, %p1064_p12  ;;  %s1331_s21 = smov 64  }
  0x15   : > { %s1332_s17 = smov 4   ;;  %s1333_s26 = smov [#allocation9]  }
  0x16   : > { %1067 = dma.hbm_to_vmem [thread:$0]  (!%p1065_p13), %s304_s11, 256, %s306_s20, [#allocation7], %s1331_s21, %s1331_s21, %s1332_s17  }
  0x17   : > { %s334_s29 = sshll.u32 %s1333_s26, 4  ;;  %370 = sbr.rel (%p1458_p10) target bundleno = 1023 (0x3ff), region = 60  ;;  %s335_s29 = int_to_ptr.vmem [resolvable:$true] %s334_s29 }
  0x18   : > { %1070 = dma.hbm_to_vmem [thread:$0]  (!%p1065_p13), %s333_s19, 256, %s335_s29, [#allocation10], %s1331_s21, %s1331_s21, %s1332_s17  }
  0x1c   : > { %1295 = dma.done.wait (%p1462_p11), [#allocation7], 256  }
  0x1d   : > { %1297 = vsyncadd (%p1462_p11), [#allocation7], 4294967040 }
  0x1e   : > { %1299 = dma.done.wait (%p1462_p11), [#allocation10], 256  }
  0x1f   : > { %1301 = vsyncadd (%p1462_p11), [#allocation10], 4294967040  ;;  %p420_p0 = scmp.lt.s32.totalorder %s1320_s16, 1  ;;  %v1049_v0 = vld [vmem:[#allocation6 + $0x8] sm:$0xff]  ;;  %v1048_v1 = vld [vmem:[#allocation6] sm:$0xff]  ;;  %vm458_vm0 = vcmask 261120  }
  0x20   : > { %v1045_v3 = vld [vmem:[%s1600_s4 + $0x8] sm:$0xff]  ;;  %546 = vmatpush.bf16.msra.mxu2 %v1049_v0  ;;  %v1044_v4 = vld [vmem:[%s1600_s4] sm:$0xff]  ;;  %vm510_vm1 = vcmask 27648   ;;  %vm553_vm2 = vcmask 31744   ;;  %s1335_s22 = smov 112   ;;  %s1336_s24 = smov 120  }
  0x21   : > { %s421_s26 = scalar_select %p420_p0, %s1320_s16, 1  ;;  %468 = vmatpush.bf16.msra.mxu0 %v1045_v3  ;;  %v1047_v8 = vld [vmem:[%s1602_s6 + $0x8] sm:$0xff]  ;;  %v1046_v9 = vld [vmem:[%s1602_s6] sm:$0xff]  ;;  %vm641_vm3 = vcmask 64512   ;;  %vm731_vm4 = vcmask 1043456   ;;  %vm785_vm5 = vcmask 64544  }
  0x22   : > { %501 = vmatpush.bf16.msra.mxu1 %v1047_v8  ;;  %v1147_v10 = vld [vmem:[%s1601_s5] ss:$0 sm:$0xff]  ;;  %s1337_s28 = smov 104   ;;  %s1338_s19 = smov 108   ;;  %vm791_vm6 = vcmask 97344   ;;  %vm797_vm7 = vcmask 130144  }
  0x23   : > { %s994_s17 = sshll.u32 %s421_s26, 3  ;;  %v1146_v13 = vld [vmem:[%s1599_s3] ss:$0 sm:$0xff]  ;;  %s1339_s29 = smov 116   ;;  %vm803_vm8 = vcmask 162944   ;;  %vm809_vm9 = vcmask 195744  }
  0x24   : > { %s426_s30 = scalar_lea.vmem %s1596_s0, %s994_s17  ;;  %s430_s20 = scalar_lea.vmem %s1597_s1, %s994_s17  ;;  %547 = vmatpush.bf16.msra.mxu2 %v1048_v1  ;;  %v1148_v35 = vld [vmem:[%s1603_s7] ss:$0 sm:$0xff]  ;;  %vm815_vm10 = vcmask 228544   ;;  %vm821_vm11 = vcmask 261344  }
  0x25   : > { %v514_v2 = vld [vmem:[%s426_s30] sm:$0xff]  ;;  %469 = vmatpush.bf16.msra.mxu0 %v1044_v4  ;;  %s1340_s26 = smov 100   ;;  %s1341_s27 = smov 4  }
  0x26   : > { %v436_v5 = vld [vmem:[%s430_s20] sm:$0xff]  ;;  %v515_v6 = vpack.c.bf16 %v514_v2, %v514_v2  ;;  %502 = vmatpush.bf16.msra.mxu1 %v1046_v9  ;;  %s1334_s20 = smov 124   ;;  %s1342_s30 = smov 8  }
  0x27   : > { %v437_v7 = vpack.c.bf16 %v436_v5, %v436_v5  ;;  %s1343_s11 = smov 16   ;;  %s1344_s12 = smov 12  }
  0x28   : > { %1022 = vmatmul.msk.bf16.vlgmr.msra.gmra.mxu2 %vm458_vm0, %v515_v6 }
  0x29   : > { %1004 = vmatmul.msk.bf16.vlgmr.msra.gmra.mxu0 %vm458_vm0, %v437_v7  ;;  %1013 = vmatmul.msk.bf16.vlgmr.msra.gmra.mxu1 %vm458_vm0, %v437_v7 }
  0xa6   : > { %v471_v11 = vpop.f32.mrf.mxu0  ;;  %v504_v36 = vpop.f32.mrf.mxu1 }
  0xa7   : > { %v472_v12 = vadd.f32 %v1147_v10, %v471_v11  ;;  %v505_v37 = vadd.f32 %v1148_v35, %v504_v36 }
  0xa9   : > { %v508_v14 = vmul.f32 0.5, %v472_v12  ;;  %v512_v38 = vpack.c.bf16 %v505_v37, %v505_v37 }
  0xab   : > { %v549_v15 = vpop.f32.mrf.mxu2  ;;  %v509_v16 = vpack.c.bf16 %v508_v14, %v508_v14  ;;  %513 = vst.msk [vmem:[#allocation3] sm:$0xf] %vm510_vm1, %v512_v38 }
  0xac   : > { %v550_v17 = vadd.f32 %v1146_v13, %v549_v15 }
  0xad   : > { %511 = vst.msk [vmem:[#allocation2] sm:$0xf] %vm510_vm1, %v509_v16 }
  0xae   : > { %554 = vst.msk [vmem:[#allocation4] sm:$0xff] %vm553_vm2, %v550_v17  ;;  %556 = vrot.lane.b32.xlu2 %v550_v17, %s1334_s20  ;;  %568 = vrot.lane.b32.xlu1 %v550_v17, %s1335_s22  ;;  %v473_v18 = vpop.f32.mrf.mxu0  ;;  %v506_v39 = vpop.f32.mrf.mxu1  ;;  %s1345_s20 = smov 24   ;;  %s1346_s22 = smov 28  }
  0xaf   : > { %560 = vrot.lane.b32.xlu0 %v550_v17, %s1336_s24  ;;  %s1347_s24 = smov 20  }
  0xb2   : > { %v718_v48 = vld [vmem:[#allocation3] sm:$0xf] }
  0xb3   : > { %v551_v19 = vpop.f32.mrf.mxu2  ;;  %v733_v49 = vsel %vm731_vm4, %v718_v48, 0 }
  0xb4   : > { %v596_v20 = vld [vmem:[#allocation2] sm:$0xf]  ;;  %742 = vmatpush.bf16.msrb.mxu0 %v733_v49  ;;  %1053 = vmatpush.bf16.msrb.mxu2 %v733_v49 }
  0xb5   : > { %v610_v21 = vsel %vm553_vm2, %v596_v20, 0  ;;  %v584_v24 = vld [vmem:[#allocation4] sm:$0xff] }
  0xb6   : > { %576 = vrot.lane.b32.xlu2 %v550_v17, %s1337_s28  ;;  %572 = vrot.lane.b32.xlu1 %v550_v17, %s1338_s19  ;;  %s417_s28 = sand.u32 1, %s1312_s14   ;;  %s1041_s19 = sshll.u32 %s1320_s16, 3 }
  0xb7   : > { %564 = vrot.lane.b32.xlu0 %v550_v17, %s1339_s29  ;;  %619 = vmatpush.bf16.xpose.msrb.mxu1 %v610_v21  ;;  %s993_s29 = sshll.u32 %s417_s28, 3  ;;  %s874_s21 = scalar_lea.hbm %s1606_s10, %s1041_s19 }
  0xb8   : > { %1052 = vmatpush.bf16.xpose.msra.mxu3 %v610_v21  ;;  %s863_s16 = scalar_lea.sflag [#allocation8], %s417_s28 }
  0xbf   : > { %580 = vrot.lane.b32.xlu0 %v550_v17, %s1340_s26 }
 0x108   : > { %v557_v22 = vpop.permute.xlu2 %556 }
 0x109   : > { %559 = vst.msk [vmem:[#allocation4 + $0x8] sm:$0xff] %vm553_vm2, %v557_v22 }
 0x110   : > { %v577_v23 = vpop.permute.xlu2 %576  ;;  %v585_v25 = vld [vmem:[#allocation4 + $0x8] sm:$0xff] }
 0x111   : > { %579 = vst.msk [vmem:[#allocation4 + $0x30] sm:$0xff] %vm553_vm2, %v577_v23  ;;  %v592_v26 = vpack.c.bf16 %v585_v25, %v584_v24 }
 0x113   : > { %1023 = vmatmul.msk.bf16.vlgmr.msrb.gmra.mxu1 %vm553_vm2, %v592_v26 }
 0x118   : > { %v590_v44 = vld [vmem:[#allocation4 + $0x30] sm:$0xff] }
 0x120   : > { %v569_v27 = vpop.permute.xlu1 %568 }
 0x121   : > { %571 = vst.msk [vmem:[#allocation4 + $0x20] sm:$0xff] %vm553_vm2, %v569_v27  ;;  %v561_v28 = vpop.permute.xlu0 %560 }
 0x122   : > { %563 = vst.msk [vmem:[#allocation4 + $0x10] sm:$0xff] %vm553_vm2, %v561_v28 }
 0x128   : > { %v573_v29 = vpop.permute.xlu1 %572  ;;  %v588_v41 = vld [vmem:[#allocation4 + $0x20] sm:$0xff] }
 0x129   : > { %575 = vst.msk [vmem:[#allocation4 + $0x28] sm:$0xff] %vm553_vm2, %v573_v29  ;;  %v565_v30 = vpop.permute.xlu0 %564  ;;  %v586_v32 = vld [vmem:[#allocation4 + $0x10] sm:$0xff] }
 0x12a   : > { %567 = vst.msk [vmem:[#allocation4 + $0x18] sm:$0xff] %vm553_vm2, %v565_v30 }
 0x130   : > { %v589_v40 = vld [vmem:[#allocation4 + $0x28] sm:$0xff] }
 0x131   : > { %v581_v31 = vpop.permute.xlu0 %580  ;;  %v587_v33 = vld [vmem:[#allocation4 + $0x18] sm:$0xff]  ;;  %v594_v42 = vpack.c.bf16 %v589_v40, %v588_v41 }
 0x132   : > { %583 = vst.msk [vmem:[#allocation4 + $0x38] sm:$0xff] %vm553_vm2, %v581_v31  ;;  %v593_v34 = vpack.c.bf16 %v587_v33, %v586_v32 }
 0x134   : > { %1024 = vmatmul.msk.bf16.vlgmr.msra.gmra.mxu3 %vm553_vm2, %v593_v34 }
 0x139   : > { %v591_v43 = vld [vmem:[#allocation4 + $0x38] sm:$0xff] }
 0x13a   : > { %v595_v45 = vpack.c.bf16 %v591_v43, %v590_v44 }
 0x144   : > { %1025 = vmatmul.msk.bf16.gmra.mxu3 %vm553_vm2, %v594_v42 }
 0x154   : > { %1026 = vmatmul.msk.bf16.gmra.mxu3 %vm553_vm2, %v595_v45 }
 0x190   : > { %v621_v46 = vpop.f32.mrf.mxu1 }
 0x191   : > { %v642_v47 = vsel %vm641_vm3, %v621_v46, -inf }
 0x192   : > { %643 = vmax.xlane.f32.xlu0 %v642_v47 }
 0x198   : > { %v623_v57 = vpop.f32.mrf.mxu1 }
 0x199   : > { %v645_v60 = vsel %vm641_vm3, %v623_v57, -inf }
 0x1b7   : > { %v626_v50 = vpop.f32.mrf.mxu3 }
 0x1b8   : > { %v648_v51 = vsel %vm641_vm3, %v626_v50, -inf }
 0x1b9   : > { %649 = vmax.xlane.f32.xlu0 %v648_v51 }
 0x1bf   : > { %v628_v52 = vpop.f32.mrf.mxu3 }
 0x1c0   : > { %v651_v62 = vsel %vm641_vm3, %v628_v52, -inf }
 0x1c7   : > { %v631_v53 = vpop.f32.mrf.mxu3 }
 0x1c8   : > { %v654_v54 = vsel %vm641_vm3, %v631_v53, -inf }
 0x1c9   : > { %655 = vmax.xlane.f32.xlu1 %v654_v54 }
 0x1cf   : > { %v633_v55 = vpop.f32.mrf.mxu3 }
 0x1d0   : > { %v657_v56 = vsel %vm641_vm3, %v633_v55, -inf }
 0x1d1   : > { %658 = vmax.xlane.f32.xlu2 %v657_v56 }
 0x1d7   : > { %v636_v58 = vpop.f32.mrf.mxu3 }
 0x1d8   : > { %v660_v59 = vsel %vm641_vm3, %v636_v58, -inf }
 0x1d9   : > { %661 = vmax.xlane.f32.xlu1 %v660_v59  ;;  %646 = vmax.xlane.f32.xlu2 %v645_v60 }
 0x1df   : > { %v638_v61 = vpop.f32.mrf.mxu3 }
 0x1e0   : > { %v663_v63 = vsel %vm641_vm3, %v638_v61, -inf }
 0x1e1   : > { %652 = vmax.xlane.f32.xlu1 %v651_v62  ;;  %664 = vmax.xlane.f32.xlu2 %v663_v63 }
 0x205   : > { %v644_v0 = vpop.xlane.xlu0 %643 }
 0x206   : > { %v666_v1 = vsub.f32 %v621_v46, %v644_v0 }
 0x208   : > { %v674_v2 = vmul.f32 1.442695, %v666_v1 }
 0x20a   : > { %1150 = vpow2.f32 %v674_v2 }
 0x210   : > { %v1151_v3 = vpop.eup %1150 }
 0x211   : > { %v690_v4 = vsel %vm641_vm3, %v1151_v3, 0.0 }
 0x212   : > { %691 = vadd.xlane.f32.xlu0 %v690_v4 }
 0x22c   : > { %v650_v5 = vpop.xlane.xlu0 %649 }
 0x22d   : > { %v668_v6 = vsub.f32 %v626_v50, %v650_v5 }
 0x22f   : > { %v678_v7 = vmul.f32 1.442695, %v668_v6 }
 0x231   : > { %1152 = vpow2.f32 %v678_v7 }
 0x237   : > { %v1153_v8 = vpop.eup %1152 }
 0x238   : > { %v696_v9 = vsel %vm641_vm3, %v1153_v8, 0.0 }
 0x239   : > { %697 = vadd.xlane.f32.xlu0 %v696_v9 }
 0x23c   : > { %v656_v10 = vpop.xlane.xlu1 %655 }
 0x23d   : > { %v670_v11 = vsub.f32 %v631_v53, %v656_v10 }
 0x23f   : > { %v682_v12 = vmul.f32 1.442695, %v670_v11 }
 0x241   : > { %1154 = vpow2.f32 %v682_v12  ;;  %v1051_v12 = vld [vmem:[#allocation9 + $0x8] sm:$0xff] }
 0x242   : > { %854 = vmatpush.bf16.msra.mxu1 %v1051_v12 }
 0x244   : > { %v659_v13 = vpop.xlane.xlu2 %658 }
 0x245   : > { %v671_v14 = vsub.f32 %v633_v55, %v659_v13  ;;  %v1050_v13 = vld [vmem:[#allocation9] sm:$0xff] }
 0x246   : > { %855 = vmatpush.bf16.msra.mxu1 %v1050_v13 }
 0x247   : > { %v684_v15 = vmul.f32 1.442695, %v671_v14  ;;  %v1155_v19 = vpop.eup %1154 }
 0x248   : > { %v702_v39 = vsel %vm641_vm3, %v1155_v19, 0.0 }
 0x249   : > { %1156 = vpow2.f32 %v684_v15 }
 0x24c   : > { %v662_v16 = vpop.xlane.xlu1 %661  ;;  %v647_v17 = vpop.xlane.xlu2 %646 }
 0x24d   : > { %v667_v18 = vsub.f32 %v623_v57, %v647_v17  ;;  %v672_v22 = vsub.f32 %v636_v58, %v662_v16 }
 0x24f   : > { %v1157_v20 = vpop.eup %1156  ;;  %v676_v21 = vmul.f32 1.442695, %v667_v18  ;;  %v686_v25 = vmul.f32 1.442695, %v672_v22 }
 0x250   : > { %v705_v23 = vsel %vm641_vm3, %v1157_v20, 0.0  ;;  %v716_v24 = vpack.c.bf16 %v1157_v20, %v1155_v19 }
 0x251   : > { %706 = vadd.xlane.f32.xlu0 %v705_v23  ;;  %1158 = vpow2.f32 %v676_v21  ;;  %v1149_v23 = vld [vmem:[%s1605_s9] ss:$0 sm:$0xff] }
 0x252   : > { %1029 = vmatmul.msk.bf16.vlgmr.msrb.gmra.mxu2 %vm641_vm3, %v716_v24  ;;  %1160 = vpow2.f32 %v686_v25 }
 0x254   : > { %v653_v26 = vpop.xlane.xlu1 %652  ;;  %v665_v27 = vpop.xlane.xlu2 %664 }
 0x255   : > { %v669_v28 = vsub.f32 %v628_v52, %v653_v26  ;;  %v673_v29 = vsub.f32 %v638_v61, %v665_v27 }
 0x257   : > { %v680_v30 = vmul.f32 1.442695, %v669_v28  ;;  %v688_v31 = vmul.f32 1.442695, %v673_v29  ;;  %v1159_v32 = vpop.eup %1158 }
 0x258   : > { %v693_v33 = vsel %vm641_vm3, %v1159_v32, 0.0  ;;  %v714_v34 = vpack.c.bf16 %v1159_v32, %v1151_v3  ;;  %v1161_v35 = vpop.eup %1160 }
 0x259   : > { %1162 = vpow2.f32 %v680_v30  ;;  %694 = vadd.xlane.f32.xlu2 %v693_v33  ;;  %v708_v41 = vsel %vm641_vm3, %v1161_v35, 0.0 }
 0x25a   : > { %1164 = vpow2.f32 %v688_v31  ;;  %1027 = vmatmul.msk.bf16.vlgmr.msrb.gmra.mxu0 %vm641_vm3, %v714_v34 }
 0x25f   : > { %v1163_v36 = vpop.eup %1162 }
 0x260   : > { %v1165_v37 = vpop.eup %1164  ;;  %v699_v38 = vsel %vm641_vm3, %v1163_v36, 0.0  ;;  %v715_v43 = vpack.c.bf16 %v1163_v36, %v1153_v8 }
 0x261   : > { %700 = vadd.xlane.f32.xlu1 %v699_v38  ;;  %v717_v40 = vpack.c.bf16 %v1165_v37, %v1161_v35  ;;  %703 = vadd.xlane.f32.xlu2 %v702_v39  ;;  %v711_v42 = vsel %vm641_vm3, %v1165_v37, 0.0 }
 0x263   : > { %1030 = vmatmul.msk.bf16.gmra.mxu2 %vm641_vm3, %v717_v40 }
 0x269   : > { %709 = vadd.xlane.f32.xlu1 %v708_v41  ;;  %712 = vadd.xlane.f32.xlu2 %v711_v42 }
 0x26a   : > { %1028 = vmatmul.msk.bf16.gmra.mxu0 %vm641_vm3, %v715_v43 }
 0x285   : > { %v692_v44 = vpop.xlane.xlu0 %691 }
 0x286   : > { %1166 = vrcp.f32 %v692_v44 }
 0x28c   : > { %v1167_v47 = vpop.eup %1166 }
 0x2ac   : > { %v698_v53 = vpop.xlane.xlu0 %697 }
 0x2c4   : > { %v707_v2 = vpop.xlane.xlu0 %706 }
 0x2cc   : > { %v695_v45 = vpop.xlane.xlu2 %694 }
 0x2cd   : > { %1168 = vrcp.f32 %v695_v45 }
 0x2d3   : > { %v1169_v54 = vpop.eup %1168 }
 0x2d4   : > { %v701_v50 = vpop.xlane.xlu1 %700  ;;  %v704_v51 = vpop.xlane.xlu2 %703 }
 0x2d5   : > { %v754_v46 = vpop.f32.mrf.mxu2  ;;  %1170 = vrcp.f32 %v704_v51 }
 0x2d6   : > { %1172 = vrcp.f32 %v698_v53 }
 0x2d7   : > { %v744_v48 = vpop.f32.mrf.mxu0  ;;  %1174 = vrcp.f32 %v701_v50 }
 0x2d8   : > { %v772_v49 = vmul.f32 %v1167_v47, %v744_v48 }
 0x2da   : > { %780 = vst.msk [vmem:[#allocation5] sm:$0xff] %vm553_vm2, %v772_v49 }
 0x2db   : > { %v1171_v57 = vpop.eup %1170 }
 0x2dc   : > { %v710_v59 = vpop.xlane.xlu1 %709  ;;  %v1173_v60 = vpop.eup %1172  ;;  %v776_v63 = vmul.f32 %v1171_v57, %v754_v46 }
 0x2dd   : > { %v756_v52 = vpop.f32.mrf.mxu2  ;;  %v713_v61 = vpop.xlane.xlu2 %712  ;;  %1176 = vrcp.f32 %v710_v59 }
 0x2de   : > { %1178 = vrcp.f32 %v713_v61  ;;  %v1175_v1 = vpop.eup %1174 }
 0x2df   : > { %v746_v55 = vpop.f32.mrf.mxu0  ;;  %1180 = vrcp.f32 %v707_v2 }
 0x2e0   : > { %v773_v56 = vmul.f32 %v1169_v54, %v746_v55 }
 0x2e2   : > { %782 = vrot.lane.b32.xlu1 %v773_v56, %s1341_s27 }
 0x2e3   : > { %v1177_v4 = vpop.eup %1176 }
 0x2e4   : > { %v1179_v6 = vpop.eup %1178 }
 0x2e5   : > { %v1181_v10 = vpop.eup %1180 }
 0x2e6   : > { %v759_v58 = vpop.f32.mrf.mxu2  ;;  %v777_v11 = vmul.f32 %v1181_v10, %v756_v52 }
 0x2e7   : > { %v749_v62 = vpop.f32.mrf.mxu0  ;;  %v778_v7 = vmul.f32 %v1177_v4, %v759_v58 }
 0x2e8   : > { %v774_v0 = vmul.f32 %v1173_v60, %v749_v62 }
 0x2ea   : > { %788 = vrot.lane.b32.xlu2 %v774_v0, %s1342_s30  ;;  %800 = vrot.lane.b32.xlu1 %v776_v63, %s1343_s11  ;;  %s419_s11 = scalar_lea.vmem [#allocation11], %s993_s29  ;;  %s1262_s29 = scalar_lea.hbm %s1606_s10, 16 }
 0x2ee   : > { %v761_v3 = vpop.f32.mrf.mxu2 }
 0x2ef   : > { %v751_v5 = vpop.f32.mrf.mxu0  ;;  %v779_v9 = vmul.f32 %v1179_v6, %v761_v3 }
 0x2f0   : > { %v775_v8 = vmul.f32 %v1175_v1, %v751_v5 }
 0x2f2   : > { %794 = vrot.lane.b32.xlu0 %v775_v8, %s1344_s12  ;;  %812 = vrot.lane.b32.xlu2 %v778_v7, %s1345_s20  ;;  %s876_s12 = sshll.u32 %s419_s11, 4  ;;  %s878_s20 = sshll.u32 %s874_s21, 4  ;;  %s877_s12 = int_to_ptr.vmem [resolvable:$true] %s876_s12  ;;  %s879_s20 = int_to_ptr.hbm [resolvable:$true] %s878_s20 }
 0x2f3   : > { %818 = vrot.lane.b32.xlu1 %v779_v9, %s1346_s22  ;;  %s1256_s22 = sshra.s32 %s879_s20, 4  ;;  %s1257_s22 = int_to_ptr.hbm [resolvable:$true] %s1256_s22 }
 0x2f4   : > { %p1263_p5 = scmp.lt.s32.totalorder %s1257_s22, %s1606_s10 }
 0x2fa   : > { %806 = vrot.lane.b32.xlu0 %v777_v11, %s1347_s24  ;;  %s1258_s24 = scalar_lea.hbm %s1257_s22, 8 }
 0x2fb   : > { %p1259_p1 = scmp.ne.s32.totalorder %s1257_s22, %s1258_s24  ;;  %p1264_p6 = scmp.lt.s32.totalorder %s1262_s29, %s1258_s24 }
 0x2fd   : > { %p1260_p2 = pnand %p1259_p1, %p1443_p4  ;;  %p1265_p7 = por %p1264_p6, %p1263_p5 }
 0x2ff   : > { %p1261_p3 = pneg %p1260_p2 }
 0x301   : > { %p1266_p9 = pnand %p1265_p7, %p1261_p3 }
 0x344   : > { %v789_v15 = vpop.permute.xlu2 %788 }
 0x34c   : > { %v813_v19 = vpop.permute.xlu2 %812 }
 0x354   : > { %v783_v14 = vpop.permute.xlu1 %782 }
 0x355   : > { %786 = vst.msk [vmem:[#allocation5] sm:$0xff] %vm785_vm5, %v783_v14 }
 0x356   : > { %792 = vst.msk [vmem:[#allocation5] sm:$0xff] %vm791_vm6, %v789_v15 }
 0x35c   : > { %v801_v16 = vpop.permute.xlu1 %800 }
 0x364   : > { %v795_v17 = vpop.permute.xlu0 %794 }
 0x365   : > { %798 = vst.msk [vmem:[#allocation5] sm:$0xff] %vm797_vm7, %v795_v17  ;;  %v819_v20 = vpop.permute.xlu1 %818 }
 0x366   : > { %804 = vst.msk [vmem:[#allocation5] sm:$0xff] %vm803_vm8, %v801_v16 }
 0x36c   : > { %v807_v18 = vpop.permute.xlu0 %806 }
 0x36d   : > { %810 = vst.msk [vmem:[#allocation5] sm:$0xff] %vm809_vm9, %v807_v18 }
 0x36e   : > { %816 = vst.msk [vmem:[#allocation5] sm:$0xff] %vm815_vm10, %v813_v19 }
 0x36f   : > { %822 = vst.msk [vmem:[#allocation5] sm:$0xff] %vm821_vm11, %v819_v20 }
 0x376   : > { %v823_v21 = vld [vmem:[#allocation5] sm:$0xff] }
 0x377   : > { %v824_v22 = vpack.c.bf16 %v823_v21, %v823_v21 }
 0x379   : > { %1039 = vmatmul.msk.bf16.vlgmr.msra.gmra.mxu1 %vm458_vm0, %v824_v22 }
 0x3f6   : > { %v857_v24 = vpop.f32.mrf.mxu1 }
 0x3f7   : > { %v858_v25 = vadd.f32 %v1149_v23, %v857_v24 }
 0x3f9   : > { %861 = vst.msk [vmem:[%s419_s11] sm:$0xff] %vm458_vm0, %v858_v25 }
 0x3fa   : > { %1269 = shalt.err (!%p1266_p9)
}
 0x3fb   : > { %1062 = dma.vmem_to_hbm [thread:$0]  (%p1443_p4), %s877_s12, 128, %s879_s20, %s863_s16  }
 0x3fe   : > { %v859_v26 = vpop.f32.mrf.mxu1 }
 0x3ff PF: > { %p1079_p10 = scmp.ge.s32.totalorder %s1328_s18, 2  ;;  %s890_s28 = sand.u32 1, %s1308_s13  }
 0x400   : > { %s891_s27 = scalar_lea.sflag [#allocation8], %s890_s28 }
 0x401   : > { %p1072_p11 = pnand %p1079_p10, %p1450_p8 }
 0x403   : > { %p1073_p12 = pneg %p1072_p11 }
 0x405   : > { %1303 = dma.done.wait (%p1073_p12), %s891_s27, 128  }
 0x406   : > { %1305 = vsyncadd (%p1073_p12), %s891_s27, 4294967168  ;;  %s25_s18 = sadd.s32 1, %s1328_s18   ;;  %s1616_s23 = sld [smem:[#allocation17_spill]] }
 0x407   : > { %p22_p13 = scmp.ge.s32.totalorder %s25_s18, 4   ;;  %s1617_s16 = sld [smem:[#allocation15_spill]] }
 0x408   : > { %s1618_s17 = sld [smem:[#allocation16_spill]]  ;;  %s1619_s13 = smov %s1312_s14 }
 0x409   : > { %s1620_s14 = smov %s1316_s15  ;;  %24 = sbr.rel (!%p22_p13) target bundleno = 6 (0x6), region = 111 }
 0x40c   : > { %s1621_s15 = smov %s1616_s23 }
 0x40e   :  { %897 = vsyncpa [#allocation7], 1 }
 0x40f   :  { %899 = vsyncpa [#allocation7 + $0x1], 1 }
 0x410   :  { %900 = vsyncpa [#allocation10], 1 }
 0x411   :  { %901 = vsyncpa [#allocation8], 1 }
 0x412   :  { %903 = vsyncpa [#allocation8 + $0x1], 1 }

</bundles_post_ra>
